<compile_context>
chip_gen: v7x
topology: tpu7x:2x2x1
jax: 0.10.0
libtpu: 0.0.40
codegen_flags: <defaults>
</compile_context>

<pallas_src>
import jax
import jax.numpy as jnp
from jax.experimental import pallas as pl
from jax.experimental.pallas import tpu as pltpu


def qnetwork_kernel(x_ref, w1_ref, b1_ref, w2_ref, b2_ref, o_ref):
    """Fused dual-head MLP: (Bt,S)@(S,2H) -> ReLU -> (Bt,2H)@(2H,2A)."""
    x = x_ref[...].astype(jnp.float32)
    h = jnp.dot(x, w1_ref[...], preferred_element_type=jnp.float32) + b1_ref[...]
    h = jnp.maximum(h, 0.0)
    y = jnp.dot(h, w2_ref[...], preferred_element_type=jnp.float32) + b2_ref[...]
    o_ref[...] = y.astype(o_ref.dtype)


def pack_params(params):
    """One-time fusion of the two heads' weights (call at init / after updates).

    First layer: heads side by side -> hidden layout is [head1 | head2] (2H lanes).
    Second layer: block-diagonal (2H, 2A) so the heads stay independent.
    """
    H = params["w11"].shape[1]
    A = params["w12"].shape[1]
    w1 = jnp.concatenate([params["w11"], params["w21"]], axis=1)          # (S, 2H)
    b1 = jnp.concatenate([params["b11"], params["b21"]], axis=1)          # (1, 2H)
    w2 = (jnp.zeros((2 * H, 2 * A), jnp.float32)
          .at[:H, :A].set(params["w12"])
          .at[H:, A:].set(params["w22"]))                                 # (2H, 2A)
    b2 = jnp.concatenate([params["b12"], params["b22"]], axis=1)          # (1, 2A)
    return {"w1": w1, "b1": b1, "w2": w2, "b2": b2}


def _pick_batch_tile(B, block_b):
    """Largest multiple-of-8 tile <= block_b that divides B (if one exists)."""
    bt = max(8, (min(block_b, B) // 8) * 8)
    if B % bt == 0:
        return bt
    t = bt
    while t > 8 and B % t:
        t -= 8
    return t if B % t == 0 else bt


def qnetwork_forward(x, fused, *, block_b=2048):
    """x: (B, state_dim) float32. fused: output of pack_params().

    Returns (q1, q2), each (B, action_dim), matching the PyTorch forward.
    """
    B, S = x.shape
    w1, b1, w2, b2 = fused["w1"], fused["b1"], fused["w2"], fused["b2"]
    H2 = w1.shape[1]           # 2 * hidden (128)
    OUT = w2.shape[1]          # 2 * action_dim (lane-masked stores are cheap here)
    A = OUT // 2

    # Batch tiling: avoid the jnp.pad copy whenever Bt can divide B.
    Bt = _pick_batch_tile(B, block_b)
    if B % Bt == 0:
        Bpad, xin = B, x
    else:  # ragged-B fallback only
        Bpad = pl.cdiv(B, Bt) * Bt
        xin = jnp.pad(x, ((0, Bpad - B), (0, 0)))
    grid = (Bpad // Bt,)

    out = pl.pallas_call(
        qnetwork_kernel,
        out_shape=jax.ShapeDtypeStruct((Bpad, OUT), jnp.float32),
        grid=grid,
        in_specs=[
            pl.BlockSpec((Bt, S), lambda i: (i, 0)),     # batch tile streams
            pl.BlockSpec((S, H2), lambda i: (0, 0)),     # weights pinned in VMEM
            pl.BlockSpec((1, H2), lambda i: (0, 0)),
            pl.BlockSpec((H2, OUT), lambda i: (0, 0)),
            pl.BlockSpec((1, OUT), lambda i: (0, 0)),
        ],
        out_specs=pl.BlockSpec((Bt, OUT), lambda i: (i, 0)),
        compiler_params=pltpu.CompilerParams(
            dimension_semantics=("parallel",)),
    )(xin, w1, b1, w2, b2)

    q1 = out[:B, :A]
    q2 = out[:B, A:OUT]
    return q1, q2


def xavier_uniform(key, fan_in, fan_out, gain=1.0):
    # Matches torch.nn.init.xavier_uniform_ bound; stored as (in, out).
    bound = gain * (6.0 / (fan_in + fan_out)) ** 0.5
    return jax.random.uniform(key, (fan_in, fan_out), jnp.float32, -bound, bound)


def init_params(key, state_dim, hidden, action_dim):
    k = jax.random.split(key, 4)
    return {
        "w11": xavier_uniform(k[0], state_dim, hidden),
        "b11": jnp.zeros((1, hidden), jnp.float32),
        "w12": xavier_uniform(k[1], hidden, action_dim),
        "b12": jnp.zeros((1, action_dim), jnp.float32),
        "w21": xavier_uniform(k[2], state_dim, hidden),
        "b21": jnp.zeros((1, hidden), jnp.float32),
        "w22": xavier_uniform(k[3], hidden, action_dim),
        "b22": jnp.zeros((1, action_dim), jnp.float32),
    }


if __name__ == "__main__":
    # CartPole-v0: state_dim=4, action_dim=2. Small batch.
    B, STATE_DIM, HIDDEN, ACTION_DIM = 8, 4, 64, 2

    key = jax.random.PRNGKey(0)
    kx, kp = jax.random.split(key)
    x = jax.random.normal(kx, (B, STATE_DIM), jnp.float32)
    params = init_params(kp, STATE_DIM, HIDDEN, ACTION_DIM)

    fused = pack_params(params)               # one-time weight fusion
    jax.block_until_ready(fused)

    x1, x2 = qnetwork_forward(x, fused)
    jax.block_until_ready((x1, x2))

    # Reference check in plain JAX (per-head, unfused).
    h1 = jnp.maximum(x @ params["w11"] + params["b11"], 0.0)
    r1 = h1 @ params["w12"] + params["b12"]
    h2 = jnp.maximum(x @ params["w21"] + params["b21"], 0.0)
    r2 = h2 @ params["w22"] + params["b22"]
    assert x1.shape == (B, ACTION_DIM) and x2.shape == (B, ACTION_DIM)
    assert jnp.allclose(x1, r1, atol=1e-5) and jnp.allclose(x2, r2, atol=1e-5)

    print("KERNEL_OK")
</pallas_src>

<mosaic_0001>
module attributes {stable_mosaic.version = 11 : i64} {
  func.func @qnetwork_kernel(%arg0: i32, %arg1: memref<8x4xf32, #tpu.memory_space<vmem>>, %arg2: memref<4x128xf32, #tpu.memory_space<vmem>>, %arg3: memref<1x128xf32, #tpu.memory_space<vmem>>, %arg4: memref<128x4xf32, #tpu.memory_space<vmem>>, %arg5: memref<1x4xf32, #tpu.memory_space<vmem>>, %arg6: memref<8x4xf32, #tpu.memory_space<vmem>>) attributes {dimension_semantics = [#tpu.dimension_semantics<parallel>], iteration_bounds = array<i64: 1>, scalar_prefetch = 0 : i64, scratch_operands = 0 : i64, tpu.core_type = #tpu.core_type<tc>, window_params = [{transform_indices = @transform_0, window_bounds = array<i64: 8, 4>}, {pipeline_mode = #tpu.pipeline_mode<synchronous>, transform_indices = @transform_1, window_bounds = array<i64: 4, 128>}, {pipeline_mode = #tpu.pipeline_mode<synchronous>, transform_indices = @transform_2, window_bounds = array<i64: 1, 128>}, {pipeline_mode = #tpu.pipeline_mode<synchronous>, transform_indices = @transform_3, window_bounds = array<i64: 128, 4>}, {pipeline_mode = #tpu.pipeline_mode<synchronous>, transform_indices = @transform_4, window_bounds = array<i64: 1, 4>}, {transform_indices = @transform_5, window_bounds = array<i64: 8, 4>}]} {
    %c0 = arith.constant 0 : index
    %c0_0 = arith.constant 0 : index
    %0 = vector.load %arg1[%c0, %c0_0] : memref<8x4xf32, #tpu.memory_space<vmem>>, vector<8x4xf32>
    %c0_1 = arith.constant 0 : index
    %c0_2 = arith.constant 0 : index
    %1 = vector.load %arg2[%c0_1, %c0_2] : memref<4x128xf32, #tpu.memory_space<vmem>>, vector<4x128xf32>
    %cst = arith.constant dense<0.000000e+00> : vector<8x128xf32>
    %2 = tpu.matmul %0, %1, %cst {dimension_numbers = #tpu.dot_dimension_numbers<[1], [0], [0], [1], [0, 0, 1, 1], [], []>} : vector<8x4xf32>, vector<4x128xf32>, vector<8x128xf32> -> vector<8x128xf32>
    %c0_3 = arith.constant 0 : index
    %c0_4 = arith.constant 0 : index
    %3 = vector.load %arg3[%c0_3, %c0_4] : memref<1x128xf32, #tpu.memory_space<vmem>>, vector<1x128xf32>
    %4 = vector.broadcast %3 : vector<1x128xf32> to vector<8x128xf32>
    %5 = arith.addf %2, %4 : vector<8x128xf32>
    %cst_5 = arith.constant 0.000000e+00 : f32
    %6 = vector.broadcast %cst_5 : f32 to vector<8x128xf32>
    %7 = arith.maximumf %5, %6 : vector<8x128xf32>
    %c0_6 = arith.constant 0 : index
    %c0_7 = arith.constant 0 : index
    %8 = vector.load %arg4[%c0_6, %c0_7] : memref<128x4xf32, #tpu.memory_space<vmem>>, vector<128x4xf32>
    %cst_8 = arith.constant dense<0.000000e+00> : vector<8x4xf32>
    %9 = tpu.matmul %7, %8, %cst_8 {dimension_numbers = #tpu.dot_dimension_numbers<[1], [0], [0], [1], [0, 0, 1, 1], [], []>} : vector<8x128xf32>, vector<128x4xf32>, vector<8x4xf32> -> vector<8x4xf32>
    %c0_9 = arith.constant 0 : index
    %c0_10 = arith.constant 0 : index
    %10 = vector.load %arg5[%c0_9, %c0_10] : memref<1x4xf32, #tpu.memory_space<vmem>>, vector<1x4xf32>
    %11 = vector.broadcast %10 : vector<1x4xf32> to vector<8x4xf32>
    %12 = arith.addf %9, %11 : vector<8x4xf32>
    %c0_11 = arith.constant 0 : index
    %c0_12 = arith.constant 0 : index
    %13 = vector.load %arg6[%c0_11, %c0_12] : memref<8x4xf32, #tpu.memory_space<vmem>>, vector<8x4xf32>
    tpu.vector_store %arg6[%c0_11, %c0_12], %12 {strides = array<i32>} : memref<8x4xf32, #tpu.memory_space<vmem>>, vector<8x4xf32>,
    return
  }
  func.func @transform_0(%arg0: i32) -> (i32, i32) {
    %c0_i32 = arith.constant 0 : i32
    %c0_i32_0 = arith.constant 0 : i32
    return %arg0, %c0_i32 : i32, i32
  }
  func.func @transform_1(%arg0: i32) -> (i32, i32) {
    %c0_i32 = arith.constant 0 : i32
    %c0_i32_0 = arith.constant 0 : i32
    %c0_i32_1 = arith.constant 0 : i32
    return %c0_i32, %c0_i32_0 : i32, i32
  }
  func.func @transform_2(%arg0: i32) -> (i32, i32) {
    %c0_i32 = arith.constant 0 : i32
    %c0_i32_0 = arith.constant 0 : i32
    %c0_i32_1 = arith.constant 0 : i32
    return %c0_i32, %c0_i32_0 : i32, i32
  }
  func.func @transform_3(%arg0: i32) -> (i32, i32) {
    %c0_i32 = arith.constant 0 : i32
    %c0_i32_0 = arith.constant 0 : i32
    %c0_i32_1 = arith.constant 0 : i32
    return %c0_i32, %c0_i32_0 : i32, i32
  }
  func.func @transform_4(%arg0: i32) -> (i32, i32) {
    %c0_i32 = arith.constant 0 : i32
    %c0_i32_0 = arith.constant 0 : i32
    %c0_i32_1 = arith.constant 0 : i32
    return %c0_i32, %c0_i32_0 : i32, i32
  }
  func.func @transform_5(%arg0: i32) -> (i32, i32) {
    %c0_i32 = arith.constant 0 : i32
    %c0_i32_0 = arith.constant 0 : i32
    return %arg0, %c0_i32 : i32, i32
  }
}

</mosaic_0001>

<bundles_post_ra>
// kernel: tpu_custom_call.1
= control target key start
LH: loop header
LB: loop body
LE: loop exit
PB: predicated region body
PF: predicated region fallthrough
CT: control target
= control target key end

     0   :  { %vm33_vm0 = vcmask 1043456   ;;  %vm29_vm1 = vcmask 31744   ;;  %v296_v0 = vmov 0.0   ;;  %vm297_vm2 = vmmov 0   ;;  %s394_s1 = inlined_call_operand.vmem [shape: f32[4,128], index: 1, kind: input, shape index: {}]   ;;  %s395_s0 = inlined_call_operand.vmem [shape: f32[8,4], index: 0, kind: input, shape index: {}]   ;;  %s396_s3 = inlined_call_operand.vmem [shape: f32[128,4], index: 3, kind: input, shape index: {}]   ;;  %s397_s2 = inlined_call_operand.vmem [shape: f32[1,128], index: 2, kind: input, shape index: {}]   ;;  %s398_s4 = inlined_call_operand.vmem [shape: f32[1,4], index: 4, kind: input, shape index: {}]   ;;  %s399_s5 = inlined_call_operand.vmem [shape: f32[8,4], index: 5, kind: output, shape index: {}]  }
   0x1   :  { %229 = vmatprep.subr.mxu0 %v296_v0  ;;  %v21_v1 = vld [vmem:[%s394_s1] sm:$0xf]  ;;  %231 = vmatprep.mubr.msk.f32.mxu0 %vm297_vm2, %v296_v0  ;;  %v298_v4 = vmov 0.0|0.0   ;;  %v109_v5 = vld [vmem:[%s396_s3 + $0x8] sm:$0xff]  ;;  %v110_v6 = vld [vmem:[%s396_s3 + $0x10] sm:$0xff] }
   0x2   :  { %v20_v2 = vld [vmem:[%s395_s0] sm:$0xff]  ;;  %230 = vmatpush3.msk.msra.mxu0 %vm33_vm0, %v21_v1  ;;  %269 = vmatprep.subr.bf16.mxu1 %v298_v4  ;;  %v111_v7 = vld [vmem:[%s396_s3 + $0x18] sm:$0xff]  ;;  %v113_v11 = vld [vmem:[%s396_s3 + $0x28] sm:$0xff] }
   0x3   :  { %v108_v3 = vld [vmem:[%s396_s3] sm:$0xff]  ;;  %232 = vmatmul.mubr.msk.f32.vlgmr.msra.gmra.mrb[0].mxu0 %vm29_vm1, %v20_v2  ;;  %266 = vmatprep.mubr.msk.f32.mxu1 %vm297_vm2, %v296_v0  ;;  %v273_v9 = vpack.c.bf16 %v111_v7, %v110_v6  ;;  %v114_v13 = vld [vmem:[%s396_s3 + $0x30] sm:$0xff]  ;;  %v115_v14 = vld [vmem:[%s396_s3 + $0x38] sm:$0xff] }
   0x4   :  { %v270_v8 = vpack.c.bf16 %v109_v5, %v108_v3  ;;  %v112_v10 = vld [vmem:[%s396_s3 + $0x20] sm:$0xff]  ;;  %v279_v15 = vpack.c.bf16 %v115_v14, %v114_v13  ;;  %v117_v17 = vld [vmem:[%s396_s3 + $0x48] sm:$0xff]  ;;  %v118_v19 = vld [vmem:[%s396_s3 + $0x50] sm:$0xff] }
   0x5   :  { %v276_v12 = vpack.c.bf16 %v113_v11, %v112_v10  ;;  %v116_v16 = vld [vmem:[%s396_s3 + $0x40] sm:$0xff]  ;;  %v119_v20 = vld [vmem:[%s396_s3 + $0x58] sm:$0xff]  ;;  %v121_v23 = vld [vmem:[%s396_s3 + $0x68] sm:$0xff] }
   0x6   :  { %271 = vmatpush3.bf16.msra.mxu1 %v270_v8  ;;  %v282_v18 = vpack.c.bf16 %v117_v17, %v116_v16  ;;  %v285_v21 = vpack.c.bf16 %v119_v20, %v118_v19  ;;  %v120_v22 = vld [vmem:[%s396_s3 + $0x60] sm:$0xff]  ;;  %v122_v25 = vld [vmem:[%s396_s3 + $0x70] sm:$0xff]  ;;  %v123_v26 = vld [vmem:[%s396_s3 + $0x78] sm:$0xff] }
   0x7   :  { %272 = vmatprep.subr.bf16.mxu1 %v298_v4  ;;  %v288_v24 = vpack.c.bf16 %v121_v23, %v120_v22  ;;  %v291_v27 = vpack.c.bf16 %v123_v26, %v122_v25  ;;  %v206_v28 = vld [vmem:[%s397_s2] ss:$0 sm:$0xff] }
   0x8   :  { %v209_v33 = vld [vmem:[%s398_s4] ss:$0 sm:$0xff] }
   0xa   :  { %274 = vmatpush3.bf16.msra.mxu1 %v273_v9 }
   0xb   :  { %275 = vmatprep.subr.bf16.mxu1 %v298_v4 }
   0xe   :  { %277 = vmatpush3.bf16.msra.mxu1 %v276_v12 }
   0xf   :  { %278 = vmatprep.subr.bf16.mxu1 %v298_v4 }
  0x12   :  { %280 = vmatpush3.bf16.msra.mxu1 %v279_v15 }
  0x13   :  { %281 = vmatprep.subr.bf16.mxu1 %v298_v4 }
  0x16   :  { %283 = vmatpush3.bf16.msra.mxu1 %v282_v18 }
  0x17   :  { %284 = vmatprep.subr.bf16.mxu1 %v298_v4 }
  0x1a   :  { %286 = vmatpush3.bf16.msra.mxu1 %v285_v21 }
  0x1b   :  { %287 = vmatprep.subr.bf16.mxu1 %v298_v4 }
  0x1e   :  { %289 = vmatpush3.bf16.msra.mxu1 %v288_v24 }
  0x1f   :  { %290 = vmatprep.subr.bf16.mxu1 %v298_v4 }
  0x22   :  { %292 = vmatpush3.bf16.msra.mxu1 %v291_v27 }
  0xd6   :  { %v103_v29 = vpop.f32.mrb[0].mxu0 }
  0xd7   :  { %v104_v30 = vadd.f32 %v206_v28, %v103_v29  ;;  %v233_v31 = vpop.f32.mrb[1].mxu0 }
  0xd9   :  { %v107_v32 = vmax.f32 %v104_v30, 0.0 }
  0xdb   :  { %267 = vmatmul.mubr.f32.vlgmr.msra.gmra.mrb[0].mxu1 %v107_v32 }
 0x1ae   :  { %v197_v34 = vpop.f32.mrb[0].mxu1 }
 0x1af   :  { %v198_v35 = vadd.f32 %v209_v33, %v197_v34  ;;  %v268_v36 = vpop.f32.mrb[1].mxu1 }
 0x1b1   :  { %201 = vst.msk [vmem:[%s399_s5] sm:$0xff] %vm29_vm1, %v198_v35 }

</bundles_post_ra>
